<compile_context>
chip_gen: v5e
topology: v5e:2x2
jax: 0.10.0
libtpu: 0.0.40
codegen_flags: <defaults>
</compile_context>

<pallas_src>
import functools

import jax
import jax.numpy as jnp
from jax.experimental import pallas as pl
from jax.experimental.pallas import tpu as pltpu

_BN_EPS = 1e-5
_VMEM_LIMIT = 48 * 1024 * 1024  # safe on v7x (64 MiB physical) and below


def _pick_tile(dim, align, max_tile):
    """Largest divisor of `dim` that is a multiple of `align` and <= max_tile.

    Falls back to the full extent (always legal for BlockSpec) if none exists.
    """
    if dim <= max_tile:
        return dim
    t = (max_tile // align) * align
    while t >= align:
        if dim % t == 0:
            return t
        t -= align
    return dim


def _matmul_stats_kernel(w_ref, x_ref, y_ref, sum_ref, ssq_ref):
    # w_ref:   (TM, in_dim)
    # x_ref:   (in_dim, TL)   (B grid dim squeezed)
    # y_ref:   (TM, TL)       linear output tile (f32)
    # sum_ref: (TM, 1)        per-channel sum, resident across (B, L) axes
    # ssq_ref: (TM, 1)        per-channel sum of squares
    b = pl.program_id(1)
    l = pl.program_id(2)

    y = jnp.dot(w_ref[...], x_ref[...], preferred_element_type=jnp.float32)
    y_ref[...] = y

    @pl.when((b == 0) & (l == 0))
    def _():
        sum_ref[...] = jnp.zeros_like(sum_ref)
        ssq_ref[...] = jnp.zeros_like(ssq_ref)

    sum_ref[...] += jnp.sum(y, axis=1, keepdims=True)
    ssq_ref[...] += jnp.sum(y * y, axis=1, keepdims=True)


def _bn_relu_kernel(scale_ref, shift_ref, y_ref, o_ref):
    # scale_ref/shift_ref: (TM, 1), y_ref/o_ref: (TM, TL)
    o_ref[...] = jnp.maximum(
        y_ref[...] * scale_ref[...] + shift_ref[...], 0.0
    ).astype(o_ref.dtype)


@functools.partial(jax.jit, static_argnames=("compute_dtype",))
def linlayer_forward(x, w, b, gamma, beta, *, compute_dtype=jnp.float32):
    """x: (B, in_dim, L) float32 -> (B, out_dim, L) float32.

    Set compute_dtype=jnp.bfloat16 to feed the MXU natively (accumulation and
    BN statistics stay in f32); default f32 matches the PyTorch module bitwise
    semantics more closely.
    """
    B, in_dim, L = x.shape
    out_dim = w.shape[0]
    n = B * L

    # The Linear bias cancels exactly under training-mode BatchNorm
    # (per-channel mean subtraction), so it is intentionally unused.
    del b

    TL = _pick_tile(L, 128, 1024)       # lane axis tile (multiple of 128 or full L)
    TM = _pick_tile(out_dim, 8, 256)    # sublane axis tile (multiple of 8 or full)
    nl = L // TL
    nm = out_dim // TM

    w_in = w.astype(compute_dtype)
    x_in = x.astype(compute_dtype)

    # ---------------- phase 1: matmul + streaming BN statistics ----------------
    mm_cost = pl.CostEstimate(
        flops=2 * out_dim * in_dim * n + 4 * out_dim * n,
        transcendentals=0,
        bytes_accessed=x_in.dtype.itemsize * in_dim * n
        + w_in.dtype.itemsize * out_dim * in_dim
        + 4 * out_dim * n,
    )

    y, ch_sum, ch_ssq = pl.pallas_call(
        _matmul_stats_kernel,
        out_shape=(
            jax.ShapeDtypeStruct((B, out_dim, L), jnp.float32),
            jax.ShapeDtypeStruct((out_dim, 1), jnp.float32),
            jax.ShapeDtypeStruct((out_dim, 1), jnp.float32),
        ),
        grid=(nm, B, nl),
        in_specs=[
            pl.BlockSpec((TM, in_dim), lambda m, bb, ll: (m, 0)),        # W tile
            pl.BlockSpec((None, in_dim, TL), lambda m, bb, ll: (bb, 0, ll)),  # X tile
        ],
        out_specs=(
            pl.BlockSpec((None, TM, TL), lambda m, bb, ll: (bb, m, ll)),  # Y tile
            pl.BlockSpec((TM, 1), lambda m, bb, ll: (m, 0)),              # sum
            pl.BlockSpec((TM, 1), lambda m, bb, ll: (m, 0)),              # sumsq
        ),
        compiler_params=pltpu.CompilerParams(
            dimension_semantics=("parallel", "arbitrary", "arbitrary"),
            vmem_limit_bytes=_VMEM_LIMIT,
        ),
        cost_estimate=mm_cost,
    )(w_in, x_in)

    # ---------------- per-channel scale/shift (O(out_dim), plain JAX) ----------
    mean = ch_sum / n
    var = jnp.maximum(ch_ssq / n - mean * mean, 0.0)
    inv = jax.lax.rsqrt(var + _BN_EPS)
    scale = gamma.reshape(out_dim, 1) * inv
    shift = beta.reshape(out_dim, 1) - mean * scale

    # ---------------- phase 2: fused scale*y + shift, ReLU ---------------------
    bn_cost = pl.CostEstimate(
        flops=2 * out_dim * n,
        transcendentals=0,
        bytes_accessed=8 * out_dim * n,
    )

    out = pl.pallas_call(
        _bn_relu_kernel,
        out_shape=jax.ShapeDtypeStruct((B, out_dim, L), jnp.float32),
        grid=(nm, B, nl),
        in_specs=[
            pl.BlockSpec((TM, 1), lambda m, bb, ll: (m, 0)),                 # scale
            pl.BlockSpec((TM, 1), lambda m, bb, ll: (m, 0)),                 # shift
            pl.BlockSpec((None, TM, TL), lambda m, bb, ll: (bb, m, ll)),     # Y tile
        ],
        out_specs=pl.BlockSpec((None, TM, TL), lambda m, bb, ll: (bb, m, ll)),
        compiler_params=pltpu.CompilerParams(
            dimension_semantics=("parallel", "parallel", "parallel"),
            vmem_limit_bytes=_VMEM_LIMIT,
        ),
        cost_estimate=bn_cost,
    )(scale, shift, y)

    return out


def _reference(x, w, b, gamma, beta):
    # pure-JAX reference mirroring the PyTorch module (training-mode BN)
    y = jnp.einsum("bil,oi->bol", x, w) + b[None, :, None]
    mean = jnp.mean(y, axis=(0, 2), keepdims=True)
    var = jnp.mean((y - mean) ** 2, axis=(0, 2), keepdims=True)
    y = (y - mean) / jnp.sqrt(var + _BN_EPS)
    y = y * gamma[None, :, None] + beta[None, :, None]
    return jnp.maximum(y, 0.0)


if __name__ == "__main__":
    B, in_dim, out_dim, L = 2, 32, 16, 8

    key = jax.random.PRNGKey(0)
    k_x, k_w, k_b = jax.random.split(key, 3)

    x = jax.random.normal(k_x, (B, in_dim, L), dtype=jnp.float32)

    # deterministic parameter init (shapes from nn.Linear / nn.BatchNorm1d)
    bound = 1.0 / (in_dim ** 0.5)
    w = jax.random.uniform(k_w, (out_dim, in_dim), minval=-bound, maxval=bound,
                           dtype=jnp.float32)
    b = jax.random.uniform(k_b, (out_dim,), minval=-bound, maxval=bound,
                           dtype=jnp.float32)
    gamma = jnp.ones((out_dim,), dtype=jnp.float32)   # BN weight init
    beta = jnp.zeros((out_dim,), dtype=jnp.float32)   # BN bias init

    out = linlayer_forward(x, w, b, gamma, beta)
    jax.block_until_ready(out)

    ref = _reference(x, w, b, gamma, beta)
    assert out.shape == (B, out_dim, L)
    assert jnp.allclose(out, ref, atol=1e-4, rtol=1e-4)

    print("KERNEL_OK")
</pallas_src>

<mosaic_0001>
module attributes {stable_mosaic.version = 11 : i64} {
  func.func @_matmul_stats_kernel(%arg0: i32, %arg1: i32, %arg2: i32, %arg3: memref<16x32xf32, #tpu.memory_space<vmem>>, %arg4: memref<1x32x8xf32, #tpu.memory_space<vmem>>, %arg5: memref<1x16x8xf32, #tpu.memory_space<vmem>>, %arg6: memref<16x1xf32, #tpu.memory_space<vmem>>, %arg7: memref<16x1xf32, #tpu.memory_space<vmem>>) attributes {dimension_semantics = [#tpu.dimension_semantics<parallel>, #tpu.dimension_semantics<arbitrary>, #tpu.dimension_semantics<arbitrary>], iteration_bounds = array<i64: 1, 2, 1>, scalar_prefetch = 0 : i64, scratch_operands = 0 : i64, tpu.core_type = #tpu.core_type<tc>, window_params = [{transform_indices = @transform_0, window_bounds = array<i64: 16, 32>}, {transform_indices = @transform_1, window_bounds = array<i64: 1, 32, 8>}, {transform_indices = @transform_2, window_bounds = array<i64: 1, 16, 8>}, {transform_indices = @transform_3, window_bounds = array<i64: 16, 1>}, {transform_indices = @transform_4, window_bounds = array<i64: 16, 1>}]} {
    %c0 = arith.constant 0 : index
    %c0_0 = arith.constant 0 : index
    %0 = vector.load %arg3[%c0, %c0_0] : memref<16x32xf32, #tpu.memory_space<vmem>>, vector<16x32xf32>
    %c0_1 = arith.constant 0 : index
    %c0_2 = arith.constant 0 : index
    %c0_3 = arith.constant 0 : index
    %1 = vector.load %arg4[%c0_1, %c0_2, %c0_3] : memref<1x32x8xf32, #tpu.memory_space<vmem>>, vector<1x32x8xf32>
    %2 = vector.shape_cast %1 : vector<1x32x8xf32> to vector<32x8xf32>
    %cst = arith.constant dense<0.000000e+00> : vector<16x8xf32>
    %3 = tpu.matmul %0, %2, %cst {dimension_numbers = #tpu.dot_dimension_numbers<[1], [0], [0], [1], [0, 0, 1, 1], [], []>} : vector<16x32xf32>, vector<32x8xf32>, vector<16x8xf32> -> vector<16x8xf32>
    %c0_4 = arith.constant 0 : index
    %c0_5 = arith.constant 0 : index
    %c0_6 = arith.constant 0 : index
    %4 = vector.load %arg5[%c0_4, %c0_5, %c0_6] : memref<1x16x8xf32, #tpu.memory_space<vmem>>, vector<1x16x8xf32>
    %5 = vector.shape_cast %4 : vector<1x16x8xf32> to vector<16x8xf32>
    %6 = vector.shape_cast %3 : vector<16x8xf32> to vector<1x16x8xf32>
    tpu.vector_store %arg5[%c0_4, %c0_5, %c0_6], %6 {strides = array<i32>} : memref<1x16x8xf32, #tpu.memory_space<vmem>>, vector<1x16x8xf32>,
    %c0_i32 = arith.constant 0 : i32
    %7 = arith.cmpi eq, %arg1, %c0_i32 : i32
    %c0_i32_7 = arith.constant 0 : i32
    %8 = arith.cmpi eq, %arg2, %c0_i32_7 : i32
    %9 = arith.andi %7, %8 : i1
    %10 = arith.extui %9 : i1 to i32
    %c0_i32_8 = arith.constant 0 : i32
    %11 = arith.cmpi ne, %10, %c0_i32_8 : i32
    scf.if %11 {
      %cst_19 = arith.constant 0.000000e+00 : f32
      %23 = vector.broadcast %cst_19 : f32 to vector<16x1xf32>
      %c0_20 = arith.constant 0 : index
      %c0_21 = arith.constant 0 : index
      %24 = vector.load %arg6[%c0_20, %c0_21] : memref<16x1xf32, #tpu.memory_space<vmem>>, vector<16x1xf32>
      tpu.vector_store %arg6[%c0_20, %c0_21], %23 {strides = array<i32>} : memref<16x1xf32, #tpu.memory_space<vmem>>, vector<16x1xf32>,
      %cst_22 = arith.constant 0.000000e+00 : f32
      %25 = vector.broadcast %cst_22 : f32 to vector<16x1xf32>
      %c0_23 = arith.constant 0 : index
      %c0_24 = arith.constant 0 : index
      %26 = vector.load %arg7[%c0_23, %c0_24] : memref<16x1xf32, #tpu.memory_space<vmem>>, vector<16x1xf32>
      tpu.vector_store %arg7[%c0_23, %c0_24], %25 {strides = array<i32>} : memref<16x1xf32, #tpu.memory_space<vmem>>, vector<16x1xf32>,
    } else {
    }
    %c0_9 = arith.constant 0 : index
    %c0_10 = arith.constant 0 : index
    %12 = vector.load %arg6[%c0_9, %c0_10] : memref<16x1xf32, #tpu.memory_space<vmem>>, vector<16x1xf32>
    %cst_11 = arith.constant dense<0.000000e+00> : vector<16xf32>
    %13 = vector.multi_reduction <add>, %3, %cst_11 [1] : vector<16x8xf32> to vector<16xf32>
    %14 = vector.shape_cast %13 : vector<16xf32> to vector<16x1xf32>
    %15 = arith.addf %12, %14 : vector<16x1xf32>
    %c0_12 = arith.constant 0 : index
    %c0_13 = arith.constant 0 : index
    %16 = vector.load %arg6[%c0_12, %c0_13] : memref<16x1xf32, #tpu.memory_space<vmem>>, vector<16x1xf32>
    tpu.vector_store %arg6[%c0_12, %c0_13], %15 {strides = array<i32>} : memref<16x1xf32, #tpu.memory_space<vmem>>, vector<16x1xf32>,
    %c0_14 = arith.constant 0 : index
    %c0_15 = arith.constant 0 : index
    %17 = vector.load %arg7[%c0_14, %c0_15] : memref<16x1xf32, #tpu.memory_space<vmem>>, vector<16x1xf32>
    %18 = arith.mulf %3, %3 : vector<16x8xf32>
    %cst_16 = arith.constant dense<0.000000e+00> : vector<16xf32>
    %19 = vector.multi_reduction <add>, %18, %cst_16 [1] : vector<16x8xf32> to vector<16xf32>
    %20 = vector.shape_cast %19 : vector<16xf32> to vector<16x1xf32>
    %21 = arith.addf %17, %20 : vector<16x1xf32>
    %c0_17 = arith.constant 0 : index
    %c0_18 = arith.constant 0 : index
    %22 = vector.load %arg7[%c0_17, %c0_18] : memref<16x1xf32, #tpu.memory_space<vmem>>, vector<16x1xf32>
    tpu.vector_store %arg7[%c0_17, %c0_18], %21 {strides = array<i32>} : memref<16x1xf32, #tpu.memory_space<vmem>>, vector<16x1xf32>,
    return
  }
  func.func @transform_0(%arg0: i32, %arg1: i32, %arg2: i32) -> (i32, i32) {
    %c0_i32 = arith.constant 0 : i32
    %c0_i32_0 = arith.constant 0 : i32
    return %arg0, %c0_i32 : i32, i32
  }
  func.func @transform_1(%arg0: i32, %arg1: i32, %arg2: i32) -> (i32, i32, i32) {
    %c0_i32 = arith.constant 0 : i32
    %c0_i32_0 = arith.constant 0 : i32
    return %arg1, %c0_i32, %arg2 : i32, i32, i32
  }
  func.func @transform_2(%arg0: i32, %arg1: i32, %arg2: i32) -> (i32, i32, i32) {
    %c0_i32 = arith.constant 0 : i32
    return %arg1, %arg0, %arg2 : i32, i32, i32
  }
  func.func @transform_3(%arg0: i32, %arg1: i32, %arg2: i32) -> (i32, i32) {
    %c0_i32 = arith.constant 0 : i32
    %c0_i32_0 = arith.constant 0 : i32
    return %arg0, %c0_i32 : i32, i32
  }
  func.func @transform_4(%arg0: i32, %arg1: i32, %arg2: i32) -> (i32, i32) {
    %c0_i32 = arith.constant 0 : i32
    %c0_i32_0 = arith.constant 0 : i32
    return %arg0, %c0_i32 : i32, i32
  }
}

module attributes {stable_mosaic.version = 11 : i64} {
  func.func @_bn_relu_kernel(%arg0: i32, %arg1: i32, %arg2: i32, %arg3: memref<16x1xf32, #tpu.memory_space<vmem>>, %arg4: memref<16x1xf32, #tpu.memory_space<vmem>>, %arg5: memref<1x16x8xf32, #tpu.memory_space<vmem>>, %arg6: memref<1x16x8xf32, #tpu.memory_space<vmem>>) attributes {dimension_semantics = [#tpu.dimension_semantics<parallel>, #tpu.dimension_semantics<parallel>, #tpu.dimension_semantics<parallel>], iteration_bounds = array<i64: 1, 2, 1>, scalar_prefetch = 0 : i64, scratch_operands = 0 : i64, tpu.core_type = #tpu.core_type<tc>, window_params = [{transform_indices = @transform_0, window_bounds = array<i64: 16, 1>}, {transform_indices = @transform_1, window_bounds = array<i64: 16, 1>}, {transform_indices = @transform_2, window_bounds = array<i64: 1, 16, 8>}, {transform_indices = @transform_3, window_bounds = array<i64: 1, 16, 8>}]} {
    %c0 = arith.constant 0 : index
    %c0_0 = arith.constant 0 : index
    %c0_1 = arith.constant 0 : index
    %0 = vector.load %arg5[%c0, %c0_0, %c0_1] : memref<1x16x8xf32, #tpu.memory_space<vmem>>, vector<1x16x8xf32>
    %1 = vector.shape_cast %0 : vector<1x16x8xf32> to vector<16x8xf32>
    %c0_2 = arith.constant 0 : index
    %c0_3 = arith.constant 0 : index
    %2 = vector.load %arg3[%c0_2, %c0_3] : memref<16x1xf32, #tpu.memory_space<vmem>>, vector<16x1xf32>
    %3 = vector.broadcast %2 : vector<16x1xf32> to vector<16x8xf32>
    %4 = arith.mulf %1, %3 : vector<16x8xf32>
    %c0_4 = arith.constant 0 : index
    %c0_5 = arith.constant 0 : index
    %5 = vector.load %arg4[%c0_4, %c0_5] : memref<16x1xf32, #tpu.memory_space<vmem>>, vector<16x1xf32>
    %6 = vector.broadcast %5 : vector<16x1xf32> to vector<16x8xf32>
    %7 = arith.addf %4, %6 : vector<16x8xf32>
    %cst = arith.constant 0.000000e+00 : f32
    %8 = vector.broadcast %cst : f32 to vector<16x8xf32>
    %9 = arith.maximumf %7, %8 : vector<16x8xf32>
    %c0_6 = arith.constant 0 : index
    %c0_7 = arith.constant 0 : index
    %c0_8 = arith.constant 0 : index
    %10 = vector.load %arg6[%c0_6, %c0_7, %c0_8] : memref<1x16x8xf32, #tpu.memory_space<vmem>>, vector<1x16x8xf32>
    %11 = vector.shape_cast %10 : vector<1x16x8xf32> to vector<16x8xf32>
    %12 = vector.shape_cast %9 : vector<16x8xf32> to vector<1x16x8xf32>
    tpu.vector_store %arg6[%c0_6, %c0_7, %c0_8], %12 {strides = array<i32>} : memref<1x16x8xf32, #tpu.memory_space<vmem>>, vector<1x16x8xf32>,
    return
  }
  func.func @transform_0(%arg0: i32, %arg1: i32, %arg2: i32) -> (i32, i32) {
    %c0_i32 = arith.constant 0 : i32
    %c0_i32_0 = arith.constant 0 : i32
    return %arg0, %c0_i32 : i32, i32
  }
  func.func @transform_1(%arg0: i32, %arg1: i32, %arg2: i32) -> (i32, i32) {
    %c0_i32 = arith.constant 0 : i32
    %c0_i32_0 = arith.constant 0 : i32
    return %arg0, %c0_i32 : i32, i32
  }
  func.func @transform_2(%arg0: i32, %arg1: i32, %arg2: i32) -> (i32, i32, i32) {
    %c0_i32 = arith.constant 0 : i32
    return %arg1, %arg0, %arg2 : i32, i32, i32
  }
  func.func @transform_3(%arg0: i32, %arg1: i32, %arg2: i32) -> (i32, i32, i32) {
    %c0_i32 = arith.constant 0 : i32
    return %arg1, %arg0, %arg2 : i32, i32, i32
  }
}

</mosaic_0001>

<bundles_post_ra>
// kernel: linlayer_forward.2
= control target key start
LH: loop header
LB: loop body
LE: loop exit
PB: predicated region body
PF: predicated region fallthrough
CT: control target
= control target key end

     0   :  { %s651_s15 = smov 0   ;;  %s653_s16 = smov 0   ;;  %s737_s0 = inlined_call_operand.vmem [shape: f32[16,32], index: 0, kind: input, shape index: {}]   ;;  %s738_s1 = inlined_call_operand.vmem [shape: f32[2,32,8], index: 1, kind: input, shape index: {}]   ;;  %s739_s2 = inlined_call_operand.vmem [shape: f32[2,16,8], index: 2, kind: output, shape index: {0}]   ;;  %s740_s3 = inlined_call_operand.vmem [shape: f32[16,1], index: 3, kind: output, shape index: {1}]   ;;  %s741_s4 = inlined_call_operand.vmem [shape: f32[16,1], index: 4, kind: output, shape index: {2}]  }
   0x1   :  { %s655_s17 = smov 0  }
   0x2 LB: > { %s30_s18 = sadd.s32 1, %s619_s16  ;;  %p555_p0 = scmp.ge.s32.totalorder %s623_s17, 1  ;;  %s623_s17 = sphi %s655_s17, %s15_s17   ;;  %s619_s16 = sphi %s653_s16, %s743_s16   ;;  %s615_s15 = sphi %s651_s15, %s742_s15  }
   0x3   : > { %p32_p1 = scmp.ge.s32.totalorder %s30_s18, 2  ;;  %p206_p2 = scmp.lt.s32.totalorder %s623_s17, 3 }
   0x5   : > { %s745_s18 = smov (%p32_p1, %s30_s18), 0  ;;  %p207_p3 = pnand %p555_p0, %p206_p2 }
   0x6   : > { %p263_p4 = scmp.lt.s32.totalorder (!%p207_p3), %s615_s15, 1  ;;  %p335_p5 = scmp.eq.s32.totalorder (!%p207_p3), %s615_s15, 0 }
   0x7   : > { %210 = sbr.rel (%p207_p3) target bundleno = 282 (0x11a), region = 28 }
   0xc   : > { %s264_s19 = scalar_select %p263_p4, %s615_s15, 1  ;;  %v296_v4 = vld [vmem:[%s737_s0] sm:$0xff]  ;;  %vm302_vm0 = vcmask 261120   ;;  %v297_v5 = vld [vmem:[%s737_s0 + $0x8] sm:$0xff]  ;;  %vm332_vm1 = vcmask 64512   ;;  %vm341_vm2 = vcmask (%p335_p5), 7168  }
   0xd   : > { %v625_v8 = vmov (%p335_p5), 0.0  }
   0xe   : > { %s569_s20 = sshll.u32 %s264_s19, 5  ;;  %s570_s28 = sshll.u32 %s264_s19, 4  ;;  %342 = vst.msk [vmem:[%s740_s3] sm:$0xff] (%p335_p5), %vm341_vm2, %v625_v8 }
   0xf   : > { %s270_s23 = scalar_lea.vmem %s738_s1, %s569_s20  ;;  %s282_s5 = scalar_lea.vmem %s739_s2, %s570_s28  ;;  %343 = vst.msk [vmem:[%s740_s3 + $0x8] sm:$0xff] (%p335_p5), %vm341_vm2, %v625_v8 }
  0x10   : > { %v301_v0 = vld [vmem:[%s270_s23 + $0x18] sm:$0xff]  ;;  %v300_v1 = vld [vmem:[%s270_s23 + $0x10] sm:$0xff]  ;;  %v299_v2 = vld [vmem:[%s270_s23 + $0x8] sm:$0xff]  ;;  %344 = vst.msk [vmem:[%s741_s4] sm:$0xff] (%p335_p5), %vm341_vm2, %v625_v8 }
  0x11   : > { %321 = vmatpush.msra.mxu0 %v301_v0  ;;  %572 = vmatpush.msra.mxu1 %v301_v0  ;;  %v298_v3 = vld [vmem:[%s270_s23] sm:$0xff]  ;;  %345 = vst.msk [vmem:[%s741_s4 + $0x8] sm:$0xff] (%p335_p5), %vm341_vm2, %v625_v8 }
  0x13   : > { %322 = vmatpush.msra.mxu0 %v300_v1  ;;  %573 = vmatpush.msra.mxu1 %v300_v1 }
  0x15   : > { %323 = vmatpush.msra.mxu0 %v299_v2  ;;  %574 = vmatpush.msra.mxu1 %v299_v2 }
  0x17   : > { %324 = vmatpush.msra.mxu0 %v298_v3  ;;  %575 = vmatpush.msra.mxu1 %v298_v3 }
  0x18   : > { %560 = vmatmul.msk.f32.vlgmr.msra.gmra.mxu0 %vm302_vm0, %v296_v4  ;;  %561 = vmatmul.msk.f32.vlgmr.msra.gmra.mxu1 %vm302_vm0, %v297_v5 }
  0x93   : > { %340 = sbr.rel (!%p335_p5) target bundleno = 152 (0x98), region = 32 }
  0x95   : > { %v326_v6 = vpop.f32.mrf.mxu0  ;;  %v329_v7 = vpop.f32.mrf.mxu1 }
  0x96   : > { %333 = vst.msk [vmem:[%s282_s5] sm:$0xff] %vm332_vm1, %v326_v6 }
  0x97   : > { %334 = vst.msk [vmem:[%s282_s5 + $0x8] sm:$0xff] %vm332_vm1, %v329_v7 }
  0x98 PF: > { %v361_v9 = vmul.f32 %v326_v6, %v326_v6  ;;  %v348_v10 = vsel %vm332_vm1, %v326_v6, 0.0  ;;  %v362_v12 = vmul.f32 %v329_v7, %v329_v7  ;;  %v351_v13 = vsel %vm332_vm1, %v329_v7, 0.0  ;;  %v346_v15 = vld [vmem:[%s740_s3] sm:$0xff]  ;;  %v347_v21 = vld [vmem:[%s740_s3 + $0x8] sm:$0xff] }
  0x99   : > { %349 = vadd.xlane.f32.xlu0 %v348_v10  ;;  %vm356_vm3 = vcmask 7168   ;;  %v359_v16 = vld [vmem:[%s741_s4] sm:$0xff]  ;;  %v360_v22 = vld [vmem:[%s741_s4 + $0x8] sm:$0xff] }
  0x9a   : > { %v363_v11 = vsel %vm332_vm1, %v361_v9, 0.0  ;;  %v366_v14 = vsel %vm332_vm1, %v362_v12, 0.0 }
  0x9b   : > { %364 = vadd.xlane.f32.xlu1 %v363_v11 }
  0xa1   : > { %352 = vadd.xlane.f32.xlu0 %v351_v13 }
  0xa3   : > { %367 = vadd.xlane.f32.xlu1 %v366_v14 }
 0x10c   : > { %v350_v17 = vpop.xlane.xlu0 %349 }
 0x10d   : > { %v354_v18 = vadd.f32 %v350_v17, %v346_v15 }
 0x10e   : > { %v365_v19 = vpop.xlane.xlu1 %364 }
 0x10f   : > { %v369_v20 = vadd.f32 %v365_v19, %v359_v16  ;;  %357 = vst.msk [vmem:[%s740_s3] sm:$0xff] %vm356_vm3, %v354_v18 }
 0x111   : > { %371 = vst.msk [vmem:[%s741_s4] sm:$0xff] %vm356_vm3, %v369_v20 }
 0x114   : > { %v353_v23 = vpop.xlane.xlu0 %352 }
 0x115   : > { %v355_v24 = vadd.f32 %v353_v23, %v347_v21 }
 0x116   : > { %v368_v25 = vpop.xlane.xlu1 %367 }
 0x117   : > { %v370_v26 = vadd.f32 %v368_v25, %v360_v22  ;;  %358 = vst.msk [vmem:[%s740_s3 + $0x8] sm:$0xff] %vm356_vm3, %v355_v24 }
 0x119   : > { %372 = vst.msk [vmem:[%s741_s4 + $0x8] sm:$0xff] %vm356_vm3, %v370_v26 }
 0x11a PF: > { %s15_s17 = sadd.s32 1, %s623_s17   ;;  %s742_s15 = smov %s619_s16 }
 0x11b   : > { %p12_p6 = scmp.ge.s32.totalorder %s15_s17, 4   ;;  %s743_s16 = smov %s745_s18 }
 0x11d   :  { %14 = sbr.rel (!%p12_p6) target bundleno = 2 (0x2), region = 89 }

// kernel: linlayer_forward.3
= control target key start
LH: loop header
LB: loop body
LE: loop exit
PB: predicated region body
PF: predicated region fallthrough
CT: control target
= control target key end

     0   :  { %s535_s12 = smov 0   ;;  %s537_s13 = smov 0   ;;  %s580_s0 = inlined_call_operand.vmem [shape: f32[16,1], index: 0, kind: input, shape index: {}]   ;;  %s581_s1 = inlined_call_operand.vmem [shape: f32[16,1], index: 1, kind: input, shape index: {}]   ;;  %s582_s2 = inlined_call_operand.vmem [shape: f32[2,16,8], index: 2, kind: input, shape index: {}]   ;;  %s583_s3 = inlined_call_operand.vmem [shape: f32[2,16,8], index: 3, kind: output, shape index: {}]  }
   0x1   :  { %s539_s14 = smov 0  }
   0x2 LB: > { %s28_s15 = sadd.s32 1, %s508_s13  ;;  %p454_p0 = scmp.ge.s32.totalorder %s512_s14, 1  ;;  %s512_s14 = sphi %s539_s14, %s13_s14   ;;  %s508_s13 = sphi %s537_s13, %s585_s13   ;;  %s504_s12 = sphi %s535_s12, %s584_s12  }
   0x3   : > { %p30_p1 = scmp.ge.s32.totalorder %s28_s15, 2  ;;  %p194_p2 = scmp.lt.s32.totalorder %s512_s14, 3 }
   0x5   : > { %s587_s15 = smov (%p30_p1, %s28_s15), 0  ;;  %p195_p3 = pnand %p454_p0, %p194_p2 }
   0x6   : > { %p255_p4 = scmp.lt.s32.totalorder (!%p195_p3), %s504_s12, 1 }
   0x7   : > { %198 = sbr.rel (%p195_p3) target bundleno = 144 (0x90), region = 32 }
   0xc   : > { %v296_v0 = vld [vmem:[%s581_s1] sm:$0xff]  ;;  %v514_v2 = vmov 0   ;;  %v297_v3 = vld [vmem:[%s581_s1 + $0x8] sm:$0xff]  ;;  %s589_s12 = smov (!%p255_p4, %s504_s12), 1  ;;  %vm312_vm0 = vcmask 64512  }
   0xd   : > { %v282_v1 = vld [vmem:[%s580_s0] sm:$0xff]  ;;  %489 = vset.pattern.permute.xlu1 %v514_v2  ;;  %488 = vset.pattern.permute.xlu0 %v514_v2  ;;  %v283_v4 = vld [vmem:[%s580_s0 + $0x8] sm:$0xff]  ;;  %s461_s24 = sshll.u32 %s589_s12, 4 }
   0xe   : > { %300 = vperm.xlu1 %489, %v296_v0   ;;  %286 = vperm.xlu0 %488, %v282_v1   ;;  %s265_s27 = scalar_lea.vmem %s582_s2, %s461_s24  ;;  %s278_s30 = scalar_lea.vmem %s583_s3, %s461_s24 }
   0xf   : > { %v280_v5 = vld [vmem:[%s265_s27] sm:$0xff]  ;;  %v281_v11 = vld [vmem:[%s265_s27 + $0x8] sm:$0xff] }
  0x16   : > { %305 = vperm.xlu1 %489, %v297_v3   ;;  %291 = vperm.xlu0 %488, %v283_v4  }
  0x80   : > { %v301_v6 = vpop.permute.xlu1 %300  ;;  %v287_v7 = vpop.permute.xlu0 %286 }
  0x81   : > { %v294_v8 = vmul.f32 %v287_v7, %v280_v5 }
  0x83   : > { %v308_v9 = vadd.f32 %v301_v6, %v294_v8 }
  0x85   : > { %v310_v10 = vmax.f32 %v308_v9, 0.0 }
  0x87   : > { %313 = vst.msk [vmem:[%s278_s30] sm:$0xff] %vm312_vm0, %v310_v10 }
  0x88   : > { %v292_v12 = vpop.permute.xlu0 %291  ;;  %v306_v14 = vpop.permute.xlu1 %305 }
  0x89   : > { %v295_v13 = vmul.f32 %v292_v12, %v281_v11 }
  0x8b   : > { %v309_v15 = vadd.f32 %v306_v14, %v295_v13 }
  0x8d   : > { %v311_v16 = vmax.f32 %v309_v15, 0.0 }
  0x8f   : > { %314 = vst.msk [vmem:[%s278_s30 + $0x8] sm:$0xff] %vm312_vm0, %v311_v16 }
  0x90 PF: > { %s13_s14 = sadd.s32 1, %s512_s14   ;;  %s584_s12 = smov %s508_s13 }
  0x91   : > { %p10_p5 = scmp.ge.s32.totalorder %s13_s14, 4   ;;  %s585_s13 = smov %s587_s15 }
  0x93   :  { %12 = sbr.rel (!%p10_p5) target bundleno = 2 (0x2), region = 68 }

</bundles_post_ra>
